<compile_context>
chip_gen: v7x
topology: tpu7x:2x2x1
jax: 0.10.0
libtpu: 0.0.40
codegen_flags: <defaults>
</compile_context>

<pallas_src>
import functools

import jax
import jax.numpy as jnp
from jax.experimental import pallas as pl
from jax.experimental.pallas import tpu as pltpu


def _addnorm_kernel(alpha_ref, bias_ref, x_ref, o_ref, *, eps: float,
                    hidden: int, k: int):
    # x_ref: (tile_rows, k*hidden) lane-dense VMEM tile; alpha/bias: (1,1) SMEM.
    x = x_ref[...].astype(jnp.float32)
    alpha = alpha_ref[0, 0]
    bias = bias_ref[0, 0]
    inv_nm1 = jnp.float32(1.0 / (hidden - 1))

    outs = []
    for c in range(k):  # k is small & static (k == 1 on the unpacked path)
        xc = x[:, c * hidden:(c + 1) * hidden]
        # Two-pass mean/var (numerically robust; the extra VPU pass is hidden
        # under the DMA — this kernel is HBM-bandwidth-bound).
        mean = jnp.mean(xc, axis=-1, keepdims=True)
        diff = xc - mean
        var = jnp.sum(diff * diff, axis=-1, keepdims=True) * inv_nm1  # unbiased
        std = jnp.sqrt(var)
        # Per-row fused scale: exact reciprocal on only (tile_rows, 1) values,
        # then one mul + one add per element (no full-width divide).
        scale = alpha * pl.reciprocal(std + jnp.float32(eps), approx=False)
        outs.append(diff * scale + bias)

    out = outs[0] if k == 1 else jnp.concatenate(outs, axis=-1)
    o_ref[...] = out.astype(o_ref.dtype)


def _native_sublane(dtype) -> int:
    """Native second-minor tile: 8 for f32, 16 for bf16, 32 for int8/fp8."""
    return max(8, 32 // jnp.dtype(dtype).itemsize)


def _vmem_capacity_bytes() -> int:
    try:
        cap = int(pltpu.get_tpu_info().vmem_capacity_bytes)
        if cap > 0:
            return cap
    except Exception:
        pass
    return 64 * 1024 * 1024  # conservative fallback (v7x physical VMEM)


def _pick_tile_rows(rows: int, width: int, dtype, *, vmem_cap: int,
                    vmem_limit: int) -> int:
    """Row tile: big enough to amortize the ~0.35 us/step grid overhead,
    small enough that double-buffered in/out + f32 intermediates fit VMEM,
    and never a single block when the input is large enough to split."""
    itemsize = jnp.dtype(dtype).itemsize
    sub = _native_sublane(dtype)

    # Per-input-buffer target: ~16 MiB on 128 MiB VMEM parts (v5e/v6e),
    # ~8 MiB on v7x (64 MiB VMEM).
    target_buf_bytes = min(16 << 20, vmem_cap // 8)
    desired = max(sub, target_buf_bytes // (width * itemsize))

    # Budget: 2x double-buffered input + 2x double-buffered output (dtype)
    # plus ~2 f32-tile intermediates (upcast x and diff) from two-pass stats.
    per_row_bytes = width * (4 * itemsize + 2 * 4)
    max_rows_by_vmem = max(sub, int(vmem_limit * 0.9) // per_row_bytes)

    t = min(desired, max_rows_by_vmem)
    t = max(sub, (t // sub) * sub)
    if rows > t:
        return t

    # Small / mid-size input: split into >=2 tiles so pipelining (and v7x
    # dual-TC sharding of the "parallel" axis) has something to overlap.
    if rows >= 2 * sub:
        n_tiles = min(4, rows // sub)
        t = -(-rows // n_tiles)                  # cdiv
        t = ((t + sub - 1) // sub) * sub         # round UP to the native tile
        return t
    return rows                                  # tiny input: one full block


def add_norm(x, alpha, bias, eps: float = 1e-6, tile_rows: int | None = None):
    """x: (..., hidden). alpha, bias: scalar parameters (shape (1,))."""
    orig_shape = x.shape
    hidden = orig_shape[-1]
    assert hidden >= 2, "hidden must be >= 2 (unbiased std divides by N-1)"
    rows = 1
    for d in orig_shape[:-1]:
        rows *= d
    rows = max(rows, 1)

    # Lane-dense packing for small hidden: fold k consecutive rows into one
    # 128-lane-wide row (pure metadata reshape on the wrapper side).
    # TODO(synk): hidden >= 128 but not a multiple of 128 could use lcm-based
    # packing; left unpacked here (still correct, just masked partial stores).
    k = 1
    if hidden < 128 and 128 % hidden == 0:
        k_cand = 128 // hidden
        if rows % k_cand == 0 and rows >= k_cand:
            k = k_cand
    rows_p = rows // k
    width = k * hidden
    x2d = x.reshape(rows_p, width)

    vmem_cap = _vmem_capacity_bytes()
    # ~96 MiB on v5e/v6e (128 MiB physical), ~48 MiB on v7x (64 MiB physical).
    vmem_limit = max(32 << 20, int(vmem_cap * 0.75))

    if tile_rows is None:
        tile_rows = _pick_tile_rows(rows_p, width, x.dtype,
                                    vmem_cap=vmem_cap, vmem_limit=vmem_limit)
    tile_rows = max(1, min(int(tile_rows), rows_p))

    num_tiles = pl.cdiv(rows_p, tile_rows)
    # (Row tiles are fully independent, so partial boundary blocks need no
    #  masking: garbage padded rows are computed but discarded on writeback.)

    alpha2d = jnp.asarray(alpha, jnp.float32).reshape(1, 1)
    bias2d = jnp.asarray(bias, jnp.float32).reshape(1, 1)

    kernel = functools.partial(_addnorm_kernel, eps=eps, hidden=hidden, k=k)

    out2d = pl.pallas_call(
        kernel,
        out_shape=jax.ShapeDtypeStruct((rows_p, width), x.dtype),
        grid_spec=pl.GridSpec(
            grid=(num_tiles,),
            in_specs=[
                pl.BlockSpec(memory_space=pltpu.MemorySpace.SMEM),    # alpha
                pl.BlockSpec(memory_space=pltpu.MemorySpace.SMEM),    # bias
                pl.BlockSpec((tile_rows, width), lambda i: (i, 0)),   # x tile
            ],
            out_specs=pl.BlockSpec((tile_rows, width), lambda i: (i, 0)),
        ),
        compiler_params=pltpu.CompilerParams(
            dimension_semantics=("parallel",),   # lets v7x split rows over 2 TCs
            vmem_limit_bytes=int(vmem_limit),
        ),
    )(alpha2d, bias2d, x2d)

    return out2d.reshape(orig_shape)


def add_norm_ref(x, alpha, bias, eps: float = 1e-6):
    """Pure-JAX reference mirroring the PyTorch forward exactly."""
    x32 = x.astype(jnp.float32)
    mean = jnp.mean(x32, axis=-1, keepdims=True)
    n = x32.shape[-1]
    var = jnp.sum((x32 - mean) ** 2, axis=-1, keepdims=True) / (n - 1)  # unbiased
    std = jnp.sqrt(var)
    return (alpha * (x32 - mean) / (std + eps) + bias).astype(x.dtype)


if __name__ == "__main__":
    key = jax.random.PRNGKey(0)

    # Parameters match nn.Parameter(torch.ones(1)) / nn.Parameter(torch.zeros(1)).
    alpha = jnp.ones((1,), dtype=jnp.float32)
    bias = jnp.zeros((1,), dtype=jnp.float32)

    # 1) Small demo shape consistent with the module's (batch, seq, hidden) use.
    #    hidden=32 exercises the lane-dense packed path (k=4, width=128).
    batch, seq, hidden = 2, 8, 32
    x = jax.random.normal(key, (batch, seq, hidden), dtype=jnp.float32)
    out = jax.block_until_ready(add_norm(x, alpha, bias, eps=1e-6))
    ref = add_norm_ref(x, alpha, bias, eps=1e-6)
    assert out.shape == x.shape and out.dtype == x.dtype
    assert jnp.allclose(out, ref, atol=1e-5, rtol=1e-5), "packed-path mismatch"

    # 2) Ragged, unpackable rows (15 % 4 != 0) with an explicit tile:
    #    grid = cdiv(15, 8) = 2 with a partial boundary block (unpacked path).
    x2 = jax.random.normal(jax.random.PRNGKey(0), (3, 5, hidden), dtype=jnp.float32)
    out2 = jax.block_until_ready(add_norm(x2, alpha, bias, eps=1e-6, tile_rows=8))
    ref2 = add_norm_ref(x2, alpha, bias, eps=1e-6)
    assert jnp.allclose(out2, ref2, atol=1e-5, rtol=1e-5), "ragged-path mismatch"

    # 3) hidden >= 128 (no packing): exercises the >=2-tile auto split so the
    #    grid is pipelined (and shardable across v7x's two TensorCores).
    x3 = jax.random.normal(jax.random.PRNGKey(0), (4, 128, 256), dtype=jnp.float32)
    out3 = jax.block_until_ready(add_norm(x3, alpha, bias, eps=1e-6))
    ref3 = add_norm_ref(x3, alpha, bias, eps=1e-6)
    assert jnp.allclose(out3, ref3, atol=1e-5, rtol=1e-5), "multi-tile mismatch"

    print("KERNEL_OK")
</pallas_src>

<mosaic_0001>
module attributes {stable_mosaic.version = 11 : i64} {
  func.func @_addnorm_kernel(%arg0: i32, %arg1: memref<1x1xf32, #tpu.memory_space<smem>>, %arg2: memref<1x1xf32, #tpu.memory_space<smem>>, %arg3: memref<4x128xf32, #tpu.memory_space<vmem>>, %arg4: memref<4x128xf32, #tpu.memory_space<vmem>>) attributes {dimension_semantics = [#tpu.dimension_semantics<parallel>], iteration_bounds = array<i64: 1>, scalar_prefetch = 0 : i64, scratch_operands = 0 : i64, tpu.core_type = #tpu.core_type<tc>, window_params = [{transform_indices = @transform_0, window_bounds = array<i64: 1, 1>}, {transform_indices = @transform_1, window_bounds = array<i64: 1, 1>}, {transform_indices = @transform_2, window_bounds = array<i64: 4, 128>}, {transform_indices = @transform_3, window_bounds = array<i64: 4, 128>}]} {
    %c0 = arith.constant 0 : index
    %c0_0 = arith.constant 0 : index
    %0 = vector.load %arg3[%c0, %c0_0] : memref<4x128xf32, #tpu.memory_space<vmem>>, vector<4x128xf32>
    %c0_1 = arith.constant 0 : index
    %c0_2 = arith.constant 0 : index
    %1 = memref.load %arg1[%c0_1, %c0_2] : memref<1x1xf32, #tpu.memory_space<smem>>
    %c0_3 = arith.constant 0 : index
    %c0_4 = arith.constant 0 : index
    %2 = memref.load %arg2[%c0_3, %c0_4] : memref<1x1xf32, #tpu.memory_space<smem>>
    %3 = vector.extract_strided_slice %0 {offsets = [0, 0], sizes = [4, 32], strides = [1, 1]} : vector<4x128xf32> to vector<4x32xf32>
    %cst = arith.constant dense<0.000000e+00> : vector<4xf32>
    %4 = vector.multi_reduction <add>, %3, %cst [1] : vector<4x32xf32> to vector<4xf32>
    %5 = vector.shape_cast %4 : vector<4xf32> to vector<4x1xf32>
    %cst_5 = arith.constant 3.200000e+01 : f32
    %6 = vector.broadcast %cst_5 : f32 to vector<4x1xf32>
    %7 = arith.divf %5, %6 : vector<4x1xf32>
    %8 = vector.broadcast %7 : vector<4x1xf32> to vector<4x32xf32>
    %9 = arith.subf %3, %8 : vector<4x32xf32>
    %10 = arith.mulf %9, %9 : vector<4x32xf32>
    %cst_6 = arith.constant dense<0.000000e+00> : vector<4xf32>
    %11 = vector.multi_reduction <add>, %10, %cst_6 [1] : vector<4x32xf32> to vector<4xf32>
    %12 = vector.shape_cast %11 : vector<4xf32> to vector<4x1xf32>
    %cst_7 = arith.constant 0.0322580636 : f32
    %13 = vector.broadcast %cst_7 : f32 to vector<4x1xf32>
    %14 = arith.mulf %12, %13 : vector<4x1xf32>
    %15 = math.sqrt %14 : vector<4x1xf32>
    %cst_8 = arith.constant 9.99999997E-7 : f32
    %16 = vector.broadcast %cst_8 : f32 to vector<4x1xf32>
    %17 = arith.addf %15, %16 : vector<4x1xf32>
    %18 = tpu.reciprocal %17 : vector<4x1xf32> -> vector<4x1xf32>
    %19 = vector.broadcast %1 : f32 to vector<4x1xf32>
    %20 = arith.mulf %19, %18 : vector<4x1xf32>
    %21 = vector.broadcast %20 : vector<4x1xf32> to vector<4x32xf32>
    %22 = arith.mulf %9, %21 : vector<4x32xf32>
    %23 = vector.broadcast %2 : f32 to vector<4x32xf32>
    %24 = arith.addf %22, %23 : vector<4x32xf32>
    %25 = vector.extract_strided_slice %0 {offsets = [0, 32], sizes = [4, 32], strides = [1, 1]} : vector<4x128xf32> to vector<4x32xf32>
    %cst_9 = arith.constant dense<0.000000e+00> : vector<4xf32>
    %26 = vector.multi_reduction <add>, %25, %cst_9 [1] : vector<4x32xf32> to vector<4xf32>
    %27 = vector.shape_cast %26 : vector<4xf32> to vector<4x1xf32>
    %cst_10 = arith.constant 3.200000e+01 : f32
    %28 = vector.broadcast %cst_10 : f32 to vector<4x1xf32>
    %29 = arith.divf %27, %28 : vector<4x1xf32>
    %30 = vector.broadcast %29 : vector<4x1xf32> to vector<4x32xf32>
    %31 = arith.subf %25, %30 : vector<4x32xf32>
    %32 = arith.mulf %31, %31 : vector<4x32xf32>
    %cst_11 = arith.constant dense<0.000000e+00> : vector<4xf32>
    %33 = vector.multi_reduction <add>, %32, %cst_11 [1] : vector<4x32xf32> to vector<4xf32>
    %34 = vector.shape_cast %33 : vector<4xf32> to vector<4x1xf32>
    %cst_12 = arith.constant 0.0322580636 : f32
    %35 = vector.broadcast %cst_12 : f32 to vector<4x1xf32>
    %36 = arith.mulf %34, %35 : vector<4x1xf32>
    %37 = math.sqrt %36 : vector<4x1xf32>
    %cst_13 = arith.constant 9.99999997E-7 : f32
    %38 = vector.broadcast %cst_13 : f32 to vector<4x1xf32>
    %39 = arith.addf %37, %38 : vector<4x1xf32>
    %40 = tpu.reciprocal %39 : vector<4x1xf32> -> vector<4x1xf32>
    %41 = vector.broadcast %1 : f32 to vector<4x1xf32>
    %42 = arith.mulf %41, %40 : vector<4x1xf32>
    %43 = vector.broadcast %42 : vector<4x1xf32> to vector<4x32xf32>
    %44 = arith.mulf %31, %43 : vector<4x32xf32>
    %45 = vector.broadcast %2 : f32 to vector<4x32xf32>
    %46 = arith.addf %44, %45 : vector<4x32xf32>
    %47 = vector.extract_strided_slice %0 {offsets = [0, 64], sizes = [4, 32], strides = [1, 1]} : vector<4x128xf32> to vector<4x32xf32>
    %cst_14 = arith.constant dense<0.000000e+00> : vector<4xf32>
    %48 = vector.multi_reduction <add>, %47, %cst_14 [1] : vector<4x32xf32> to vector<4xf32>
    %49 = vector.shape_cast %48 : vector<4xf32> to vector<4x1xf32>
    %cst_15 = arith.constant 3.200000e+01 : f32
    %50 = vector.broadcast %cst_15 : f32 to vector<4x1xf32>
    %51 = arith.divf %49, %50 : vector<4x1xf32>
    %52 = vector.broadcast %51 : vector<4x1xf32> to vector<4x32xf32>
    %53 = arith.subf %47, %52 : vector<4x32xf32>
    %54 = arith.mulf %53, %53 : vector<4x32xf32>
    %cst_16 = arith.constant dense<0.000000e+00> : vector<4xf32>
    %55 = vector.multi_reduction <add>, %54, %cst_16 [1] : vector<4x32xf32> to vector<4xf32>
    %56 = vector.shape_cast %55 : vector<4xf32> to vector<4x1xf32>
    %cst_17 = arith.constant 0.0322580636 : f32
    %57 = vector.broadcast %cst_17 : f32 to vector<4x1xf32>
    %58 = arith.mulf %56, %57 : vector<4x1xf32>
    %59 = math.sqrt %58 : vector<4x1xf32>
    %cst_18 = arith.constant 9.99999997E-7 : f32
    %60 = vector.broadcast %cst_18 : f32 to vector<4x1xf32>
    %61 = arith.addf %59, %60 : vector<4x1xf32>
    %62 = tpu.reciprocal %61 : vector<4x1xf32> -> vector<4x1xf32>
    %63 = vector.broadcast %1 : f32 to vector<4x1xf32>
    %64 = arith.mulf %63, %62 : vector<4x1xf32>
    %65 = vector.broadcast %64 : vector<4x1xf32> to vector<4x32xf32>
    %66 = arith.mulf %53, %65 : vector<4x32xf32>
    %67 = vector.broadcast %2 : f32 to vector<4x32xf32>
    %68 = arith.addf %66, %67 : vector<4x32xf32>
    %69 = vector.extract_strided_slice %0 {offsets = [0, 96], sizes = [4, 32], strides = [1, 1]} : vector<4x128xf32> to vector<4x32xf32>
    %cst_19 = arith.constant dense<0.000000e+00> : vector<4xf32>
    %70 = vector.multi_reduction <add>, %69, %cst_19 [1] : vector<4x32xf32> to vector<4xf32>
    %71 = vector.shape_cast %70 : vector<4xf32> to vector<4x1xf32>
    %cst_20 = arith.constant 3.200000e+01 : f32
    %72 = vector.broadcast %cst_20 : f32 to vector<4x1xf32>
    %73 = arith.divf %71, %72 : vector<4x1xf32>
    %74 = vector.broadcast %73 : vector<4x1xf32> to vector<4x32xf32>
    %75 = arith.subf %69, %74 : vector<4x32xf32>
    %76 = arith.mulf %75, %75 : vector<4x32xf32>
    %cst_21 = arith.constant dense<0.000000e+00> : vector<4xf32>
    %77 = vector.multi_reduction <add>, %76, %cst_21 [1] : vector<4x32xf32> to vector<4xf32>
    %78 = vector.shape_cast %77 : vector<4xf32> to vector<4x1xf32>
    %cst_22 = arith.constant 0.0322580636 : f32
    %79 = vector.broadcast %cst_22 : f32 to vector<4x1xf32>
    %80 = arith.mulf %78, %79 : vector<4x1xf32>
    %81 = math.sqrt %80 : vector<4x1xf32>
    %cst_23 = arith.constant 9.99999997E-7 : f32
    %82 = vector.broadcast %cst_23 : f32 to vector<4x1xf32>
    %83 = arith.addf %81, %82 : vector<4x1xf32>
    %84 = tpu.reciprocal %83 : vector<4x1xf32> -> vector<4x1xf32>
    %85 = vector.broadcast %1 : f32 to vector<4x1xf32>
    %86 = arith.mulf %85, %84 : vector<4x1xf32>
    %87 = vector.broadcast %86 : vector<4x1xf32> to vector<4x32xf32>
    %88 = arith.mulf %75, %87 : vector<4x32xf32>
    %89 = vector.broadcast %2 : f32 to vector<4x32xf32>
    %90 = arith.addf %88, %89 : vector<4x32xf32>
    %91 = tpu.concatenate %24, %46, %68, %90 in 1 : vector<4x32xf32>, vector<4x32xf32>, vector<4x32xf32>, vector<4x32xf32> -> vector<4x128xf32>
    %c0_24 = arith.constant 0 : index
    %c0_25 = arith.constant 0 : index
    %92 = vector.load %arg4[%c0_24, %c0_25] : memref<4x128xf32, #tpu.memory_space<vmem>>, vector<4x128xf32>
    tpu.vector_store %arg4[%c0_24, %c0_25], %91 {strides = array<i32>} : memref<4x128xf32, #tpu.memory_space<vmem>>, vector<4x128xf32>,
    return
  }
  func.func @transform_0(%arg0: i32) -> (i32, i32) {
    %c0_i32 = arith.constant 0 : i32
    %c0_i32_0 = arith.constant 0 : i32
    %c0_i32_1 = arith.constant 0 : i32
    return %c0_i32, %c0_i32_0 : i32, i32
  }
  func.func @transform_1(%arg0: i32) -> (i32, i32) {
    %c0_i32 = arith.constant 0 : i32
    %c0_i32_0 = arith.constant 0 : i32
    %c0_i32_1 = arith.constant 0 : i32
    return %c0_i32, %c0_i32_0 : i32, i32
  }
  func.func @transform_2(%arg0: i32) -> (i32, i32) {
    %c0_i32 = arith.constant 0 : i32
    %c0_i32_0 = arith.constant 0 : i32
    return %arg0, %c0_i32 : i32, i32
  }
  func.func @transform_3(%arg0: i32) -> (i32, i32) {
    %c0_i32 = arith.constant 0 : i32
    %c0_i32_0 = arith.constant 0 : i32
    return %arg0, %c0_i32 : i32, i32
  }
}

</mosaic_0001>

<bundles_post_ra>
// kernel: tpu_custom_call.1
= control target key start
LH: loop header
LB: loop body
LE: loop exit
PB: predicated region body
PF: predicated region fallthrough
CT: control target
= control target key end

     0   :  { %s199_s14 = smov 96   ;;  %s272_s0 = inlined_call_operand.<no memory space> [shape: f32[1,1], index: 0, kind: input, shape index: {}]   ;;  %s273_s1 = inlined_call_operand.<no memory space> [shape: f32[1,1], index: 1, kind: input, shape index: {}]   ;;  %s274_s2 = inlined_call_operand.vmem [shape: f32[4,128], index: 2, kind: input, shape index: {}]   ;;  %s275_s3 = inlined_call_operand.hbm [shape: f32[4,128], index: 3, kind: output, shape index: {}]  }
   0x1   :  { %v17_v0 = vld [vmem:[%s274_s2] sm:$0xf] }
   0x2   :  { %47 = vrot.lane.b32.xlu0 %v17_v0, %s199_s14 }
   0x3   :  { %10 = vsyncpa [#allocation5], 0  ;;  %s200_s15 = smov 32   ;;  %s201_s16 = smov 64   ;;  %vm20_vm0 = vcmask 257024   ;;  %vm134_vm9 = vcmask 261120  }
   0x4   :  { %105 = vrot.lane.b32.xlu1 %v17_v0, %s200_s15  ;;  %v21_v3 = vsel %vm20_vm0, %v17_v0, 0.0  ;;  %vm136_vm10 = vcmask 523264   ;;  %vm138_vm11 = vcmask 785408  }
   0x6   :  { %76 = vrot.lane.b32.xlu0 %v17_v0, %s201_s16 }
  0x74   :  { %v48_v1 = vpop.permute.xlu0 %47 }
  0x75   :  { %v50_v2 = vsel %vm20_vm0, %v48_v1, 0.0  ;;  %v41_v1 = vstv %s272_s0  ;;  %s202_s0 = smov [#allocation4]  }
  0x76   :  { %51 = vadd.xlane.f32.xlu1 %v50_v2  ;;  %v106_v5 = vpop.permute.xlu1 %105  ;;  %s147_s20 = sshll.u32 %s202_s0, 4  ;;  %s148_s20 = int_to_ptr.vmem [resolvable:$true] %s147_s20 }
  0x77   :  { %v108_v7 = vsel %vm20_vm0, %v106_v5, 0.0  ;;  %s175_s21 = scalar_lea.vmem %s148_s20, 64  ;;  %p180_p1 = scmp.lt.s32.totalorder %s148_s20, %s148_s20 }
  0x78   :  { %v77_v4 = vpop.permute.xlu0 %76  ;;  %p176_p0 = scmp.ne.s32.totalorder %s148_s20, %s175_s21  ;;  %p181_p2 = scmp.lt.s32.totalorder %s175_s21, %s175_s21 }
  0x79   :  { %v79_v6 = vsel %vm20_vm0, %v77_v4, 0.0 }
  0x7a   :  { %80 = vadd.xlane.f32.xlu0 %v79_v6  ;;  %22 = vadd.xlane.f32.xlu1 %v21_v3  ;;  %p182_p3 = por %p181_p2, %p180_p1 }
  0x7c   :  { %p183_p4 = pnand %p182_p3, %p176_p0 }
  0x7e   :  { %109 = vadd.xlane.f32.xlu0 %v108_v7 }
 0x103   :  { %v52_v8 = vpop.xlane.xlu1 %51 }
 0x104   :  { %v53_v9 = vmul.f32 0.03125, %v52_v8 }
 0x106   :  { %v230_v10 = vsub.f32 %v17_v0, %v53_v9 }
 0x107   :  { %v81_v11 = vpop.xlane.xlu0 %80  ;;  %v23_v20 = vpop.xlane.xlu1 %22 }
 0x108   :  { %v82_v12 = vmul.f32 0.03125, %v81_v11  ;;  %v55_v13 = vmul.f32 %v230_v10, %v230_v10  ;;  %v25_v21 = vmul.f32 0.03125, %v23_v20  ;;  %v44_v11 = vstv %s273_s1 }
 0x10a   :  { %v234_v14 = vsub.f32 %v17_v0, %v82_v12  ;;  %57 = vrot.lane.b32.xlu0 %v55_v13, %s199_s14  ;;  %v242_v22 = vsub.f32 %v17_v0, %v25_v21 }
 0x10b   :  { %v110_v15 = vpop.xlane.xlu0 %109 }
 0x10c   :  { %v111_v16 = vmul.f32 0.03125, %v110_v15  ;;  %v84_v17 = vmul.f32 %v234_v14, %v234_v14  ;;  %v27_v23 = vmul.f32 %v242_v22, %v242_v22 }
 0x10e   :  { %v238_v18 = vsub.f32 %v17_v0, %v111_v16  ;;  %86 = vrot.lane.b32.xlu1 %v84_v17, %s201_s16  ;;  %v28_v24 = vsel %vm20_vm0, %v27_v23, 0.0 }
 0x110   :  { %v113_v19 = vmul.f32 %v238_v18, %v238_v18 }
 0x112   :  { %115 = vrot.lane.b32.xlu1 %v113_v19, %s200_s15 }
 0x129   :  { %29 = vadd.xlane.f32.xlu0 %v28_v24 }
 0x17c   :  { %v58_v25 = vpop.permute.xlu0 %57 }
 0x17d   :  { %v60_v26 = vsel %vm20_vm0, %v58_v25, 0.0 }
 0x17e   :  { %61 = vadd.xlane.f32.xlu1 %v60_v26 }
 0x180   :  { %v87_v27 = vpop.permute.xlu1 %86 }
 0x181   :  { %v89_v28 = vsel %vm20_vm0, %v87_v27, 0.0 }
 0x182   :  { %90 = vadd.xlane.f32.xlu0 %v89_v28 }
 0x184   :  { %v116_v29 = vpop.permute.xlu1 %115 }
 0x185   :  { %v118_v30 = vsel %vm20_vm0, %v116_v29, 0.0 }
 0x186   :  { %119 = vadd.xlane.f32.xlu0 %v118_v30 }
 0x1b6   :  { %v30_v31 = vpop.xlane.xlu0 %29 }
 0x1b7   :  { %v31_v32 = vmul.f32 0.032258064, %v30_v31 }
 0x1b9   :  { %159 = vrsqrt.f32 %v31_v32  ;;  %vm34_vm1 = vcmp.eq.f32.partialorder %v31_v32, inf  ;;  %v37_v39 = vand.u32 2147483648, %v31_v32  ;;  %vm36_vm2 = vcmp.eq.f32.partialorder %v31_v32, 0.0 }
 0x1c3   :  { %v160_v35 = vpop.eup %159 }
 0x1c4   :  { %v33_v37 = vmul.f32 %v160_v35, %v31_v32 }
 0x1c6   :  { %v35_v41 = vsel %vm34_vm1, %v31_v32, %v33_v37 }
 0x1c7   :  { %v38_v43 = vsel %vm36_vm2, %v37_v39, %v35_v41 }
 0x1c8   :  { %v39_v46 = vadd.f32 1e-06, %v38_v43 }
 0x20b   :  { %v62_v33 = vpop.xlane.xlu1 %61 }
 0x20c   :  { %v63_v34 = vmul.f32 0.032258064, %v62_v33 }
 0x20e   :  { %161 = vrsqrt.f32 %v63_v34  ;;  %vm66_vm3 = vcmp.eq.f32.partialorder %v63_v34, inf  ;;  %v69_v47 = vand.u32 2147483648, %v63_v34  ;;  %vm68_vm4 = vcmp.eq.f32.partialorder %v63_v34, 0.0 }
 0x20f   :  { %v91_v36 = vpop.xlane.xlu0 %90 }
 0x210   :  { %v92_v38 = vmul.f32 0.032258064, %v91_v36 }
 0x212   :  { %163 = vrsqrt.f32 %v92_v38  ;;  %vm95_vm5 = vcmp.eq.f32.partialorder %v92_v38, inf  ;;  %v98_v53 = vand.u32 2147483648, %v92_v38  ;;  %vm97_vm6 = vcmp.eq.f32.partialorder %v92_v38, 0.0 }
 0x213   :  { %v120_v40 = vpop.xlane.xlu0 %119 }
 0x214   :  { %v121_v42 = vmul.f32 0.032258064, %v120_v40 }
 0x216   :  { %165 = vrsqrt.f32 %v121_v42  ;;  %vm124_vm7 = vcmp.eq.f32.partialorder %v121_v42, inf  ;;  %v127_v59 = vand.u32 2147483648, %v121_v42  ;;  %vm126_vm8 = vcmp.eq.f32.partialorder %v121_v42, 0.0 }
 0x217   :  { %167 = vrcp.f32 %v39_v46 }
 0x218   :  { %v162_v44 = vpop.eup %161 }
 0x219   :  { %v65_v45 = vmul.f32 %v162_v44, %v63_v34 }
 0x21b   :  { %v67_v48 = vsel %vm66_vm3, %v63_v34, %v65_v45 }
 0x21c   :  { %v164_v49 = vpop.eup %163  ;;  %v70_v50 = vsel %vm68_vm4, %v69_v47, %v67_v48 }
 0x21d   :  { %v71_v51 = vadd.f32 1e-06, %v70_v50  ;;  %v94_v52 = vmul.f32 %v164_v49, %v92_v38 }
 0x21f   :  { %169 = vrcp.f32 %v71_v51  ;;  %v96_v54 = vsel %vm95_vm5, %v92_v38, %v94_v52 }
 0x220   :  { %v166_v55 = vpop.eup %165  ;;  %v99_v56 = vsel %vm97_vm6, %v98_v53, %v96_v54 }
 0x221   :  { %v100_v57 = vadd.f32 1e-06, %v99_v56  ;;  %v123_v58 = vmul.f32 %v166_v55, %v121_v42  ;;  %v168_v63 = vpop.eup %167 }
 0x222   :  { %v42_v3 = vmul.f32 %v168_v63, %v41_v1 }
 0x223   :  { %171 = vrcp.f32 %v100_v57  ;;  %v125_v60 = vsel %vm124_vm7, %v121_v42, %v123_v58 }
 0x224   :  { %v128_v61 = vsel %vm126_vm8, %v127_v59, %v125_v60  ;;  %v43_v7 = vmul.f32 %v42_v3, %v242_v22 }
 0x225   :  { %v129_v62 = vadd.f32 1e-06, %v128_v61 }
 0x226   :  { %v45_v16 = vadd.f32 %v44_v11, %v43_v7 }
 0x227   :  { %173 = vrcp.f32 %v129_v62 }
 0x229   :  { %v170_v0 = vpop.eup %169 }
 0x22a   :  { %v73_v2 = vmul.f32 %v170_v0, %v41_v1 }
 0x22c   :  { %v74_v5 = vmul.f32 %v73_v2, %v230_v10 }
 0x22d   :  { %v172_v4 = vpop.eup %171 }
 0x22e   :  { %v102_v6 = vmul.f32 %v172_v4, %v41_v1  ;;  %v75_v12 = vadd.f32 %v74_v5, %v44_v11 }
 0x230   :  { %v103_v8 = vmul.f32 %v102_v6, %v234_v14  ;;  %v135_v19 = vsel %vm134_vm9, %v45_v16, %v75_v12 }
 0x231   :  { %v174_v9 = vpop.eup %173 }
 0x232   :  { %v131_v13 = vmul.f32 %v174_v9, %v41_v1  ;;  %v104_v15 = vadd.f32 %v103_v8, %v44_v11 }
 0x234   :  { %v132_v17 = vmul.f32 %v131_v13, %v238_v18  ;;  %v137_v20 = vsel %vm136_vm10, %v135_v19, %v104_v15 }
 0x236   :  { %v133_v10 = vadd.f32 %v132_v17, %v44_v11 }
 0x238   :  { %v139_v14 = vsel %vm138_vm11, %v137_v20, %v133_v10 }
 0x239   :  { %140 = vst [vmem:[#allocation4] sm:$0xf] %v139_v14 }
 0x23a   :  { %186 = shalt.err (!%p183_p4)
}
 0x23b   :  { %s187_s23 = scalar_lea.hbm %s275_s3, 64 }
 0x23c   :  { %p188_p5 = scmp.ne.s32.totalorder %s275_s3, %s187_s23  ;;  %p191_p6 = scmp.lt.u32.totalorder %s187_s23, %s275_s3 }
 0x23e   :  { %p193_p7 = pnand %p191_p6, %p188_p5 }
 0x240   :  { %196 = shalt.err (!%p193_p7)
}
 0x241   :  { %150 = dma.vmem_to_hbm [thread:$0]  %s148_s20, 64, %s275_s3, [#allocation5]  }
 0x242   :  { %197 = dma.done.wait [#allocation5], 64  }
 0x243   :  { %198 = vsyncadd [#allocation5], 4294967232 }
 0x244   :  { %154 = vsyncpa [#allocation5], 1 }

</bundles_post_ra>
